<compile_context>
chip_gen: v6e
topology: v6e:2x2x1
jax: 0.10.0
libtpu: 0.0.40
codegen_flags: <defaults>
</compile_context>

<pallas_src>
import numpy as np
import jax
import jax.numpy as jnp
from jax.experimental import pallas as pl
from jax.experimental.pallas import tpu as pltpu

# ----------------------------- configuration -------------------------------
PK_ROWS, PK_COLS = 4, 8
PK_NUM = PK_ROWS * PK_COLS        # 32 prediction kernels
N_DIR = 8                         # 8 lateral directions
DYN_IN = 1                        # dynamic input size per PK
LAT = 1                           # lateral channel size per direction
PRE = 4                           # pre-layer size
LSTM_H = 16                       # lstm cells
DYN_OUT = 1                       # dynamic output size
IN_DIM = DYN_IN + N_DIR * LAT     # 9
OUT_DIM = DYN_OUT + N_DIR * LAT   # 9

# packed output columns: [dyn_out | lat_out | c | h | lat_in]
C_DYN = 0
C_LATO = C_DYN + DYN_OUT
C_C = C_LATO + N_DIR * LAT
C_H = C_C + LSTM_H
C_LATI = C_H + LSTM_H
PACK_W = C_LATI + N_DIR * LAT     # 49


# ------------------- adjacency (sphere wrapping), host side ----------------
def build_neighbor_table(rows, cols):
    """nbr[pk, d] = index of pk's neighbor in direction d (0..7), replicating
    the pk_adj_mat construction of KernelNetwork.__init__ (sphere wrap)."""
    offsets = [(-1, -1), (-1, 0), (-1, 1),     # top left, top, top right
               (0, -1), (0, 1),                # left, right
               (1, -1), (1, 0), (1, 1)]        # bottom left, bottom, bottom right
    nbr = np.zeros((rows * cols, N_DIR), dtype=np.int32)
    pk = 0
    for r in range(rows):
        for c in range(cols):
            for d, (dr, dc) in enumerate(offsets):
                nr, nc = r + dr, c + dc
                if 0 <= nr < rows and 0 <= nc < cols:
                    idx = nr * cols + nc
                elif nr == -1:
                    idx = (nc + cols // 2) % cols
                elif nr == rows:
                    idx = (rows - 1) * cols + (nc + cols // 2) % cols
                else:
                    nr %= rows
                    nc %= cols
                    idx = nr * cols + nc
                nbr[pk, d] = idx
            pk += 1
    return nbr


def build_gather_mats(nbr):
    """Constants for the two-matmul lateral gather.
    A_v[d*N + p, j] = 1 iff nbr[p, d] == j            (vstacked permutations)
    R  [p, d*N + q] = 1 iff p == q                    (per-direction re-collect)
    M  [d*N + j, d] = 1                               (direction mask)
    so that  lat_in = R @ ((A_v @ lat_out) * M)."""
    n = nbr.shape[0]
    a_v = np.zeros((N_DIR * n, n), dtype=np.float32)
    for d in range(N_DIR):
        a_v[d * n + np.arange(n), nbr[:, d]] = 1.0
    r_mat = np.tile(np.eye(n, dtype=np.float32), (1, N_DIR))      # (n, 8n)
    dmask = np.zeros((N_DIR * n, N_DIR), dtype=np.float32)
    for d in range(N_DIR):
        dmask[d * n:(d + 1) * n, d] = 1.0
    return a_v, r_mat, dmask


# ------------------------------ Pallas kernel ------------------------------
def _kernel_net_kernel(dyn_ref, init_ref, av_ref, r_ref, mask_ref,
                       w_pre_ref, w_cat_ref, b_ref, w_post_ref,
                       out_ref,
                       lat_s, c_s, h_s):
    t = pl.program_id(0)

    # ---- initialize resident state from the packed init slab at step 0 ----
    @pl.when(t == 0)
    def _init():
        lat_s[...] = init_ref[:, 0:N_DIR * LAT]
        c_s[...] = init_ref[:, N_DIR * LAT:N_DIR * LAT + LSTM_H]
        h_s[...] = init_ref[:, N_DIR * LAT + LSTM_H:N_DIR * LAT + 2 * LSTM_H]

    lat_out_prev = lat_s[...]                                   # (N, 8)

    # ---- lateral propagation: lat_in[p, d] = lat_out_prev[nbr[p, d], d] ----
    # two MXU matmuls + one mask (replaces 8 tiny perm-matmuls + concat)
    prod = jnp.dot(av_ref[...], lat_out_prev,
                   preferred_element_type=jnp.float32)          # (8N, 8)
    lat_in = jnp.dot(r_ref[...], prod * mask_ref[...],
                     preferred_element_type=jnp.float32)        # (N, 8)

    # ---- shared PredictionKernelNet (all PKs in parallel) ----
    dyn_in = dyn_ref[0]                                         # (N, 1)
    x = jnp.concatenate([dyn_in, lat_in], axis=1)               # (N, 9)
    pre = jnp.tanh(jnp.dot(x, w_pre_ref[...],
                           preferred_element_type=jnp.float32))  # (N, PRE)

    xh = jnp.concatenate([pre, h_s[...]], axis=1)               # (N, PRE+H)
    gates = jnp.dot(xh, w_cat_ref[...],
                    preferred_element_type=jnp.float32) + b_ref[...]   # (N, 4H)

    i_g = jax.nn.sigmoid(gates[:, 0 * LSTM_H:1 * LSTM_H])
    f_g = jax.nn.sigmoid(gates[:, 1 * LSTM_H:2 * LSTM_H])
    g_g = jnp.tanh(gates[:, 2 * LSTM_H:3 * LSTM_H])
    o_g = jax.nn.sigmoid(gates[:, 3 * LSTM_H:4 * LSTM_H])

    c_new = f_g * c_s[...] + i_g * g_g
    h_new = o_g * jnp.tanh(c_new)
    c_s[...] = c_new
    h_s[...] = h_new

    post = jnp.dot(h_new, w_post_ref[...],
                   preferred_element_type=jnp.float32)          # (N, 9)
    dyn_out = post[:, :DYN_OUT]
    lat_out = jnp.tanh(post[:, DYN_OUT:])
    lat_s[...] = lat_out

    # ---- single coalesced per-step store ----
    out_ref[0] = jnp.concatenate([dyn_out, lat_out, c_new, h_new, lat_in],
                                 axis=1)                        # (N, 49)


def kernel_network_rollout(dyn_seq, lat_out0, lstm_c0, lstm_h0, params):
    """Runs T consecutive KernelNetwork.forward steps (teacher forcing on
    dyn_seq) in one pallas_call. Returns
    (pk_dyn_out_seq[T,N,1], pk_lat_out, pk_lstm_c, pk_lstm_h, pk_lat_in)."""
    w_pre, w_ih, b_ih, w_hh, b_hh, w_post = params
    T = dyn_seq.shape[0]

    # host-side prep: fused LSTM weights, packed init state, gather constants
    nbr = build_neighbor_table(PK_ROWS, PK_COLS)
    a_v_np, r_np, m_np = build_gather_mats(nbr)
    a_v, r_mat, dmask = jnp.asarray(a_v_np), jnp.asarray(r_np), jnp.asarray(m_np)
    w_cat = jnp.concatenate([w_ih, w_hh], axis=0)               # (PRE+H, 4H)
    b_cat = b_ih + b_hh                                         # (1, 4H)
    init = jnp.concatenate([lat_out0, lstm_c0, lstm_h0], axis=1)  # (N, 8+2H)

    inputs = (dyn_seq, init, a_v, r_mat, dmask, w_pre, w_cat, b_cat, w_post)

    def const_spec(shape):
        return pl.BlockSpec(shape, lambda t, n=len(shape): (0,) * n)

    in_specs = [
        pl.BlockSpec((1, PK_NUM, DYN_IN), lambda t: (t, 0, 0)),  # per-step dyn_in
        const_spec(init.shape),
        const_spec(a_v.shape), const_spec(r_mat.shape), const_spec(dmask.shape),
        const_spec(w_pre.shape), const_spec(w_cat.shape),
        const_spec(b_cat.shape), const_spec(w_post.shape),
    ]
    out_shape = jax.ShapeDtypeStruct((T, PK_NUM, PACK_W), jnp.float32)
    out_specs = pl.BlockSpec((1, PK_NUM, PACK_W), lambda t: (t, 0, 0))

    packed = pl.pallas_call(
        _kernel_net_kernel,
        out_shape=out_shape,
        grid_spec=pltpu.PrefetchScalarGridSpec(
            num_scalar_prefetch=0,
            grid=(T,),
            in_specs=in_specs,
            out_specs=out_specs,
            scratch_shapes=[
                pltpu.VMEM((PK_NUM, N_DIR * LAT), jnp.float32),  # lat_out state
                pltpu.VMEM((PK_NUM, LSTM_H), jnp.float32),       # lstm c state
                pltpu.VMEM((PK_NUM, LSTM_H), jnp.float32),       # lstm h state
            ]),
        compiler_params=pltpu.CompilerParams(
            dimension_semantics=("arbitrary",)),   # sequential: state carries
    )(*inputs)

    dyn_out_seq = packed[:, :, C_DYN:C_DYN + DYN_OUT]
    last = packed[T - 1]
    lat_out = last[:, C_LATO:C_LATO + N_DIR * LAT]
    lstm_c = last[:, C_C:C_C + LSTM_H]
    lstm_h = last[:, C_H:C_H + LSTM_H]
    lat_in = last[:, C_LATI:C_LATI + N_DIR * LAT]
    return dyn_out_seq, lat_out, lstm_c, lstm_h, lat_in


# ------------------------ pure-JAX reference (check) ------------------------
def reference_rollout(nbr, dyn_seq, lat_out0, lstm_c0, lstm_h0, params):
    w_pre, w_ih, b_ih, w_hh, b_hh, w_post = params
    lat_out, c, h = lat_out0, lstm_c0, lstm_h0
    lat_in = None
    dyn_outs = []
    for t in range(dyn_seq.shape[0]):
        lat_in = lat_out[nbr, jnp.arange(N_DIR)[None, :]]       # (N, 8) gather
        x = jnp.concatenate([dyn_seq[t], lat_in], axis=1)
        pre = jnp.tanh(x @ w_pre)
        gates = pre @ w_ih + b_ih + h @ w_hh + b_hh
        i = jax.nn.sigmoid(gates[:, :LSTM_H])
        f = jax.nn.sigmoid(gates[:, LSTM_H:2 * LSTM_H])
        g = jnp.tanh(gates[:, 2 * LSTM_H:3 * LSTM_H])
        o = jax.nn.sigmoid(gates[:, 3 * LSTM_H:])
        c = f * c + i * g
        h = o * jnp.tanh(c)
        post = h @ w_post
        dyn_outs.append(post[:, :DYN_OUT])
        lat_out = jnp.tanh(post[:, DYN_OUT:])
    return jnp.stack(dyn_outs), lat_out, c, h, lat_in


# --------------------------------- main -------------------------------------
if __name__ == "__main__":
    T = 8
    key = jax.random.PRNGKey(0)
    keys = jax.random.split(key, 10)

    # deterministic synthetic parameters (PredictionKernelNet shapes)
    w_pre = 0.3 * jax.random.normal(keys[0], (IN_DIM, PRE), jnp.float32)
    w_ih = 0.3 * jax.random.normal(keys[1], (PRE, 4 * LSTM_H), jnp.float32)
    b_ih = 0.1 * jax.random.normal(keys[2], (1, 4 * LSTM_H), jnp.float32)
    w_hh = 0.3 * jax.random.normal(keys[3], (LSTM_H, 4 * LSTM_H), jnp.float32)
    b_hh = 0.1 * jax.random.normal(keys[4], (1, 4 * LSTM_H), jnp.float32)
    w_post = 0.3 * jax.random.normal(keys[5], (LSTM_H, OUT_DIM), jnp.float32)
    params = (w_pre, w_ih, b_ih, w_hh, b_hh, w_post)

    # deterministic synthetic state / input sequence
    dyn_seq = jax.random.normal(keys[6], (T, PK_NUM, DYN_IN), jnp.float32)
    lat_out0 = jax.random.normal(keys[7], (PK_NUM, N_DIR * LAT), jnp.float32)
    lstm_c0 = jax.random.normal(keys[8], (PK_NUM, LSTM_H), jnp.float32)
    lstm_h0 = jax.random.normal(keys[9], (PK_NUM, LSTM_H), jnp.float32)

    outs = kernel_network_rollout(dyn_seq, lat_out0, lstm_c0, lstm_h0, params)
    outs = jax.block_until_ready(outs)

    nbr = jnp.asarray(build_neighbor_table(PK_ROWS, PK_COLS))
    refs = reference_rollout(nbr, dyn_seq, lat_out0, lstm_c0, lstm_h0, params)
    refs = jax.block_until_ready(refs)

    for got, want in zip(outs, refs):
        np.testing.assert_allclose(np.asarray(got), np.asarray(want),
                                   rtol=1e-4, atol=1e-4)

    print("KERNEL_OK")
</pallas_src>

<mosaic_0001>
module attributes {stable_mosaic.version = 11 : i64} {
  func.func @_kernel_net_kernel(%arg0: i32, %arg1: memref<1x32x1xf32, #tpu.memory_space<vmem>>, %arg2: memref<32x40xf32, #tpu.memory_space<vmem>>, %arg3: memref<256x32xf32, #tpu.memory_space<vmem>>, %arg4: memref<32x256xf32, #tpu.memory_space<vmem>>, %arg5: memref<256x8xf32, #tpu.memory_space<vmem>>, %arg6: memref<9x4xf32, #tpu.memory_space<vmem>>, %arg7: memref<20x64xf32, #tpu.memory_space<vmem>>, %arg8: memref<1x64xf32, #tpu.memory_space<vmem>>, %arg9: memref<16x9xf32, #tpu.memory_space<vmem>>, %arg10: memref<1x32x49xf32, #tpu.memory_space<vmem>>, %arg11: memref<32x8xf32, #tpu.memory_space<vmem>>, %arg12: memref<32x16xf32, #tpu.memory_space<vmem>>, %arg13: memref<32x16xf32, #tpu.memory_space<vmem>>) attributes {dimension_semantics = [#tpu.dimension_semantics<arbitrary>], iteration_bounds = array<i64: 8>, scalar_prefetch = 0 : i64, scratch_operands = 3 : i64, tpu.core_type = #tpu.core_type<tc>, window_params = [{transform_indices = @transform_0, window_bounds = array<i64: 1, 32, 1>}, {pipeline_mode = #tpu.pipeline_mode<synchronous>, transform_indices = @transform_1, window_bounds = array<i64: 32, 40>}, {pipeline_mode = #tpu.pipeline_mode<synchronous>, transform_indices = @transform_2, window_bounds = array<i64: 256, 32>}, {pipeline_mode = #tpu.pipeline_mode<synchronous>, transform_indices = @transform_3, window_bounds = array<i64: 32, 256>}, {pipeline_mode = #tpu.pipeline_mode<synchronous>, transform_indices = @transform_4, window_bounds = array<i64: 256, 8>}, {pipeline_mode = #tpu.pipeline_mode<synchronous>, transform_indices = @transform_5, window_bounds = array<i64: 9, 4>}, {pipeline_mode = #tpu.pipeline_mode<synchronous>, transform_indices = @transform_6, window_bounds = array<i64: 20, 64>}, {pipeline_mode = #tpu.pipeline_mode<synchronous>, transform_indices = @transform_7, window_bounds = array<i64: 1, 64>}, {pipeline_mode = #tpu.pipeline_mode<synchronous>, transform_indices = @transform_8, window_bounds = array<i64: 16, 9>}, {transform_indices = @transform_9, window_bounds = array<i64: 1, 32, 49>}]} {
    %c0_i32 = arith.constant 0 : i32
    %0 = arith.cmpi eq, %arg0, %c0_i32 : i32
    %1 = arith.extui %0 : i1 to i32
    %c0_i32_0 = arith.constant 0 : i32
    %2 = arith.cmpi ne, %1, %c0_i32_0 : i32
    scf.if %2 {
      %c0_39 = arith.constant 0 : index
      %c0_40 = arith.constant 0 : index
      %61 = vector.load %arg2[%c0_39, %c0_40] : memref<32x40xf32, #tpu.memory_space<vmem>>, vector<32x8xf32>
      %c0_41 = arith.constant 0 : index
      %c0_42 = arith.constant 0 : index
      %62 = vector.load %arg11[%c0_41, %c0_42] : memref<32x8xf32, #tpu.memory_space<vmem>>, vector<32x8xf32>
      tpu.vector_store %arg11[%c0_41, %c0_42], %61 {strides = array<i32>} : memref<32x8xf32, #tpu.memory_space<vmem>>, vector<32x8xf32>,
      %c0_43 = arith.constant 0 : index
      %c8 = arith.constant 8 : index
      %63 = vector.load %arg2[%c0_43, %c8] : memref<32x40xf32, #tpu.memory_space<vmem>>, vector<32x16xf32>
      %c0_44 = arith.constant 0 : index
      %c0_45 = arith.constant 0 : index
      %64 = vector.load %arg12[%c0_44, %c0_45] : memref<32x16xf32, #tpu.memory_space<vmem>>, vector<32x16xf32>
      tpu.vector_store %arg12[%c0_44, %c0_45], %63 {strides = array<i32>} : memref<32x16xf32, #tpu.memory_space<vmem>>, vector<32x16xf32>,
      %c0_46 = arith.constant 0 : index
      %c24 = arith.constant 24 : index
      %65 = vector.load %arg2[%c0_46, %c24] : memref<32x40xf32, #tpu.memory_space<vmem>>, vector<32x16xf32>
      %c0_47 = arith.constant 0 : index
      %c0_48 = arith.constant 0 : index
      %66 = vector.load %arg13[%c0_47, %c0_48] : memref<32x16xf32, #tpu.memory_space<vmem>>, vector<32x16xf32>
      tpu.vector_store %arg13[%c0_47, %c0_48], %65 {strides = array<i32>} : memref<32x16xf32, #tpu.memory_space<vmem>>, vector<32x16xf32>,
    } else {
    }
    %c0 = arith.constant 0 : index
    %c0_1 = arith.constant 0 : index
    %3 = vector.load %arg11[%c0, %c0_1] : memref<32x8xf32, #tpu.memory_space<vmem>>, vector<32x8xf32>
    %c0_2 = arith.constant 0 : index
    %c0_3 = arith.constant 0 : index
    %4 = vector.load %arg3[%c0_2, %c0_3] : memref<256x32xf32, #tpu.memory_space<vmem>>, vector<256x32xf32>
    %cst = arith.constant dense<0.000000e+00> : vector<256x8xf32>
    %5 = tpu.matmul %4, %3, %cst {dimension_numbers = #tpu.dot_dimension_numbers<[1], [0], [0], [1], [0, 0, 1, 1], [], []>} : vector<256x32xf32>, vector<32x8xf32>, vector<256x8xf32> -> vector<256x8xf32>
    %c0_4 = arith.constant 0 : index
    %c0_5 = arith.constant 0 : index
    %6 = vector.load %arg4[%c0_4, %c0_5] : memref<32x256xf32, #tpu.memory_space<vmem>>, vector<32x256xf32>
    %c0_6 = arith.constant 0 : index
    %c0_7 = arith.constant 0 : index
    %7 = vector.load %arg5[%c0_6, %c0_7] : memref<256x8xf32, #tpu.memory_space<vmem>>, vector<256x8xf32>
    %8 = arith.mulf %5, %7 : vector<256x8xf32>
    %cst_8 = arith.constant dense<0.000000e+00> : vector<32x8xf32>
    %9 = tpu.matmul %6, %8, %cst_8 {dimension_numbers = #tpu.dot_dimension_numbers<[1], [0], [0], [1], [0, 0, 1, 1], [], []>} : vector<32x256xf32>, vector<256x8xf32>, vector<32x8xf32> -> vector<32x8xf32>
    %c0_9 = arith.constant 0 : index
    %c0_10 = arith.constant 0 : index
    %c0_11 = arith.constant 0 : index
    %10 = vector.load %arg1[%c0_9, %c0_10, %c0_11] : memref<1x32x1xf32, #tpu.memory_space<vmem>>, vector<1x32x1xf32>
    %11 = vector.shape_cast %10 : vector<1x32x1xf32> to vector<32x1xf32>
    %12 = tpu.concatenate %11, %9 in 1 : vector<32x1xf32>, vector<32x8xf32> -> vector<32x9xf32>
    %c0_12 = arith.constant 0 : index
    %c0_13 = arith.constant 0 : index
    %13 = vector.load %arg6[%c0_12, %c0_13] : memref<9x4xf32, #tpu.memory_space<vmem>>, vector<9x4xf32>
    %cst_14 = arith.constant dense<0.000000e+00> : vector<32x4xf32>
    %14 = tpu.matmul %12, %13, %cst_14 {dimension_numbers = #tpu.dot_dimension_numbers<[1], [0], [0], [1], [0, 0, 1, 1], [], []>} : vector<32x9xf32>, vector<9x4xf32>, vector<32x4xf32> -> vector<32x4xf32>
    %15 = math.tanh %14 : vector<32x4xf32>
    %c0_15 = arith.constant 0 : index
    %c0_16 = arith.constant 0 : index
    %16 = vector.load %arg13[%c0_15, %c0_16] : memref<32x16xf32, #tpu.memory_space<vmem>>, vector<32x16xf32>
    %17 = tpu.concatenate %15, %16 in 1 : vector<32x4xf32>, vector<32x16xf32> -> vector<32x20xf32>
    %c0_17 = arith.constant 0 : index
    %c0_18 = arith.constant 0 : index
    %18 = vector.load %arg7[%c0_17, %c0_18] : memref<20x64xf32, #tpu.memory_space<vmem>>, vector<20x64xf32>
    %cst_19 = arith.constant dense<0.000000e+00> : vector<32x64xf32>
    %19 = tpu.matmul %17, %18, %cst_19 {dimension_numbers = #tpu.dot_dimension_numbers<[1], [0], [0], [1], [0, 0, 1, 1], [], []>} : vector<32x20xf32>, vector<20x64xf32>, vector<32x64xf32> -> vector<32x64xf32>
    %c0_20 = arith.constant 0 : index
    %c0_21 = arith.constant 0 : index
    %20 = vector.load %arg8[%c0_20, %c0_21] : memref<1x64xf32, #tpu.memory_space<vmem>>, vector<1x64xf32>
    %21 = vector.broadcast %20 : vector<1x64xf32> to vector<32x64xf32>
    %22 = arith.addf %19, %21 : vector<32x64xf32>
    %23 = vector.extract_strided_slice %22 {offsets = [0, 0], sizes = [32, 16], strides = [1, 1]} : vector<32x64xf32> to vector<32x16xf32>
    %24 = arith.negf %23 : vector<32x16xf32>
    %25 = math.exp %24 : vector<32x16xf32>
    %cst_22 = arith.constant 1.000000e+00 : f32
    %26 = vector.broadcast %cst_22 : f32 to vector<32x16xf32>
    %27 = arith.addf %26, %25 : vector<32x16xf32>
    %28 = arith.divf %26, %27 : vector<32x16xf32>
    %29 = vector.extract_strided_slice %22 {offsets = [0, 16], sizes = [32, 16], strides = [1, 1]} : vector<32x64xf32> to vector<32x16xf32>
    %30 = arith.negf %29 : vector<32x16xf32>
    %31 = math.exp %30 : vector<32x16xf32>
    %cst_23 = arith.constant 1.000000e+00 : f32
    %32 = vector.broadcast %cst_23 : f32 to vector<32x16xf32>
    %33 = arith.addf %32, %31 : vector<32x16xf32>
    %34 = arith.divf %32, %33 : vector<32x16xf32>
    %35 = vector.extract_strided_slice %22 {offsets = [0, 32], sizes = [32, 16], strides = [1, 1]} : vector<32x64xf32> to vector<32x16xf32>
    %36 = math.tanh %35 : vector<32x16xf32>
    %37 = vector.extract_strided_slice %22 {offsets = [0, 48], sizes = [32, 16], strides = [1, 1]} : vector<32x64xf32> to vector<32x16xf32>
    %38 = arith.negf %37 : vector<32x16xf32>
    %39 = math.exp %38 : vector<32x16xf32>
    %cst_24 = arith.constant 1.000000e+00 : f32
    %40 = vector.broadcast %cst_24 : f32 to vector<32x16xf32>
    %41 = arith.addf %40, %39 : vector<32x16xf32>
    %42 = arith.divf %40, %41 : vector<32x16xf32>
    %c0_25 = arith.constant 0 : index
    %c0_26 = arith.constant 0 : index
    %43 = vector.load %arg12[%c0_25, %c0_26] : memref<32x16xf32, #tpu.memory_space<vmem>>, vector<32x16xf32>
    %44 = arith.mulf %34, %43 : vector<32x16xf32>
    %45 = arith.mulf %28, %36 : vector<32x16xf32>
    %46 = arith.addf %44, %45 : vector<32x16xf32>
    %47 = math.tanh %46 : vector<32x16xf32>
    %48 = arith.mulf %42, %47 : vector<32x16xf32>
    %c0_27 = arith.constant 0 : index
    %c0_28 = arith.constant 0 : index
    %49 = vector.load %arg12[%c0_27, %c0_28] : memref<32x16xf32, #tpu.memory_space<vmem>>, vector<32x16xf32>
    tpu.vector_store %arg12[%c0_27, %c0_28], %46 {strides = array<i32>} : memref<32x16xf32, #tpu.memory_space<vmem>>, vector<32x16xf32>,
    %c0_29 = arith.constant 0 : index
    %c0_30 = arith.constant 0 : index
    %50 = vector.load %arg13[%c0_29, %c0_30] : memref<32x16xf32, #tpu.memory_space<vmem>>, vector<32x16xf32>
    tpu.vector_store %arg13[%c0_29, %c0_30], %48 {strides = array<i32>} : memref<32x16xf32, #tpu.memory_space<vmem>>, vector<32x16xf32>,
    %c0_31 = arith.constant 0 : index
    %c0_32 = arith.constant 0 : index
    %51 = vector.load %arg9[%c0_31, %c0_32] : memref<16x9xf32, #tpu.memory_space<vmem>>, vector<16x9xf32>
    %cst_33 = arith.constant dense<0.000000e+00> : vector<32x9xf32>
    %52 = tpu.matmul %48, %51, %cst_33 {dimension_numbers = #tpu.dot_dimension_numbers<[1], [0], [0], [1], [0, 0, 1, 1], [], []>} : vector<32x16xf32>, vector<16x9xf32>, vector<32x9xf32> -> vector<32x9xf32>
    %53 = vector.extract_strided_slice %52 {offsets = [0, 0], sizes = [32, 1], strides = [1, 1]} : vector<32x9xf32> to vector<32x1xf32>
    %54 = vector.extract_strided_slice %52 {offsets = [0, 1], sizes = [32, 8], strides = [1, 1]} : vector<32x9xf32> to vector<32x8xf32>
    %55 = math.tanh %54 : vector<32x8xf32>
    %c0_34 = arith.constant 0 : index
    %c0_35 = arith.constant 0 : index
    %56 = vector.load %arg11[%c0_34, %c0_35] : memref<32x8xf32, #tpu.memory_space<vmem>>, vector<32x8xf32>
    tpu.vector_store %arg11[%c0_34, %c0_35], %55 {strides = array<i32>} : memref<32x8xf32, #tpu.memory_space<vmem>>, vector<32x8xf32>,
    %57 = tpu.concatenate %53, %55, %46, %48, %9 in 1 : vector<32x1xf32>, vector<32x8xf32>, vector<32x16xf32>, vector<32x16xf32>, vector<32x8xf32> -> vector<32x49xf32>
    %c0_36 = arith.constant 0 : index
    %c0_37 = arith.constant 0 : index
    %c0_38 = arith.constant 0 : index
    %58 = vector.load %arg10[%c0_36, %c0_37, %c0_38] : memref<1x32x49xf32, #tpu.memory_space<vmem>>, vector<1x32x49xf32>
    %59 = vector.shape_cast %58 : vector<1x32x49xf32> to vector<32x49xf32>
    %60 = vector.shape_cast %57 : vector<32x49xf32> to vector<1x32x49xf32>
    tpu.vector_store %arg10[%c0_36, %c0_37, %c0_38], %60 {strides = array<i32>} : memref<1x32x49xf32, #tpu.memory_space<vmem>>, vector<1x32x49xf32>,
    return
  }
  func.func @transform_0(%arg0: i32) -> (i32, i32, i32) {
    %c0_i32 = arith.constant 0 : i32
    %c0_i32_0 = arith.constant 0 : i32
    %c0_i32_1 = arith.constant 0 : i32
    return %arg0, %c0_i32, %c0_i32_0 : i32, i32, i32
  }
  func.func @transform_1(%arg0: i32) -> (i32, i32) {
    %c0_i32 = arith.constant 0 : i32
    %c0_i32_0 = arith.constant 0 : i32
    %c0_i32_1 = arith.constant 0 : i32
    return %c0_i32, %c0_i32_0 : i32, i32
  }
  func.func @transform_2(%arg0: i32) -> (i32, i32) {
    %c0_i32 = arith.constant 0 : i32
    %c0_i32_0 = arith.constant 0 : i32
    %c0_i32_1 = arith.constant 0 : i32
    return %c0_i32, %c0_i32_0 : i32, i32
  }
  func.func @transform_3(%arg0: i32) -> (i32, i32) {
    %c0_i32 = arith.constant 0 : i32
    %c0_i32_0 = arith.constant 0 : i32
    %c0_i32_1 = arith.constant 0 : i32
    return %c0_i32, %c0_i32_0 : i32, i32
  }
  func.func @transform_4(%arg0: i32) -> (i32, i32) {
    %c0_i32 = arith.constant 0 : i32
    %c0_i32_0 = arith.constant 0 : i32
    %c0_i32_1 = arith.constant 0 : i32
    return %c0_i32, %c0_i32_0 : i32, i32
  }
  func.func @transform_5(%arg0: i32) -> (i32, i32) {
    %c0_i32 = arith.constant 0 : i32
    %c0_i32_0 = arith.constant 0 : i32
    %c0_i32_1 = arith.constant 0 : i32
    return %c0_i32, %c0_i32_0 : i32, i32
  }
  func.func @transform_6(%arg0: i32) -> (i32, i32) {
    %c0_i32 = arith.constant 0 : i32
    %c0_i32_0 = arith.constant 0 : i32
    %c0_i32_1 = arith.constant 0 : i32
    return %c0_i32, %c0_i32_0 : i32, i32
  }
  func.func @transform_7(%arg0: i32) -> (i32, i32) {
    %c0_i32 = arith.constant 0 : i32
    %c0_i32_0 = arith.constant 0 : i32
    %c0_i32_1 = arith.constant 0 : i32
    return %c0_i32, %c0_i32_0 : i32, i32
  }
  func.func @transform_8(%arg0: i32) -> (i32, i32) {
    %c0_i32 = arith.constant 0 : i32
    %c0_i32_0 = arith.constant 0 : i32
    %c0_i32_1 = arith.constant 0 : i32
    return %c0_i32, %c0_i32_0 : i32, i32
  }
  func.func @transform_9(%arg0: i32) -> (i32, i32, i32) {
    %c0_i32 = arith.constant 0 : i32
    %c0_i32_0 = arith.constant 0 : i32
    %c0_i32_1 = arith.constant 0 : i32
    return %arg0, %c0_i32, %c0_i32_0 : i32, i32, i32
  }
}

</mosaic_0001>

<bundles_post_ra>
// kernel: tpu_custom_call.1
= control target key start
LH: loop header
LB: loop body
LE: loop exit
PB: predicated region body
PF: predicated region fallthrough
CT: control target
= control target key end

     0   :  { %14 = vsyncpa [#allocation6], 0  ;;  %s2600_s0 = inlined_call_operand.vmem [shape: f32[8,32,1], index: 0, kind: input, shape index: {}]   ;;  %s2601_s1 = inlined_call_operand.vmem [shape: f32[32,40], index: 1, kind: input, shape index: {}]   ;;  %s2602_s2 = inlined_call_operand.vmem [shape: f32[256,32], index: 2, kind: input, shape index: {}]   ;;  %s2603_s3 = inlined_call_operand.vmem [shape: f32[32,256], index: 3, kind: input, shape index: {}]   ;;  %s2604_s4 = inlined_call_operand.vmem [shape: f32[256,8], index: 4, kind: input, shape index: {}]   ;;  %s2605_s5 = inlined_call_operand.vmem [shape: f32[9,4], index: 5, kind: input, shape index: {}]   ;;  %s2606_s6 = inlined_call_operand.vmem [shape: f32[20,64], index: 6, kind: input, shape index: {}]   ;;  %s2607_s7 = inlined_call_operand.vmem [shape: f32[1,64], index: 7, kind: input, shape index: {}]   ;;  %s2608_s8 = inlined_call_operand.vmem [shape: f32[16,9], index: 8, kind: input, shape index: {}]   ;;  %s2609_s9 = inlined_call_operand.hbm [shape: f32[8,32,49], index: 9, kind: output, shape index: {}]  }
   0x1   :  { %16 = vsyncpa [#allocation6 + $0x1], 0  ;;  %s2073_s30 = smov 0   ;;  %s2075_s10 = smov 0  }
   0x2   :  { %s2077_s11 = smov 0   ;;  %s2079_s12 = smov 0  }
   0x3 LB: > { %s2094_s13 = sadd.s32 4294967295, %s2005_s12   ;;  %s1590_s14 = sadd.s32 4294967294, %s2005_s12   ;;  %s2005_s12 = sphi %s2079_s12, %s2617_s12   ;;  %s2001_s11 = sphi %s2077_s11, %s2616_s11   ;;  %s1997_s10 = sphi %s2075_s10, %s2615_s10   ;;  %s1993_s30 = sphi %s2073_s30, %s2614_s30  }
   0x4   : > { %s2098_s15 = sadd.s32 1, %s2005_s12   ;;  %s223_s16 = sadd.s32 1, %s2001_s11 }
   0x5   : > { %s220_s17 = ssub.s32 %s2005_s12, %s2098_s15  ;;  %p233_p0 = scmp.ne.s32.totalorder %s2001_s11, %s1997_s10 }
   0x6   : > { %p221_p1 = scmp.eq.s32.totalorder %s220_s17, 0  ;;  %p234_p2 = scmp.eq.s32.totalorder %s2094_s13, 7 }
   0x7   : > { %p239_p3 = scmp.ne.s32.totalorder %s1997_s10, %s1993_s30  ;;  %p240_p4 = scmp.eq.s32.totalorder %s1590_s14, 7 }
   0x8   : > { %s2109_s18 = scalar_select %p221_p1, %s2001_s11, %s223_s16  }
   0x9   : > { %p2111_p5 = por %p234_p2, %p233_p0  ;;  %p2115_p6 = por %p240_p4, %p239_p3 }
   0xa   : > { %p1593_p7 = scmp.ge.s32.totalorder %s2005_s12, 1  ;;  %p290_p8 = scmp.lt.s32.totalorder %s2005_s12, 9 }
   0xc   : > { %p291_p9 = pnand %p1593_p7, %p290_p8 }
   0xd   : > { %s2610_s21 = sand.u32 (!%p291_p9), 1, %s1997_s10   ;;  %p326_p10 = scmp.lt.s32.totalorder (!%p291_p9), %s2094_s13, 7 }
   0xe   : > { %294 = sbr.rel (%p291_p9) target bundleno = 2003 (0x7d3), region = 56  ;;  %s1594_s22 = sshll.u32 (!%p291_p9), %s2610_s21, 5 }
   0xf   : > { %s2131_s28 = scalar_lea.vmem (!%p291_p9), [#allocation5], %s1594_s22  ;;  %p1597_p11 = scmp.ne.s32.totalorder (!%p291_p9), %s2094_s13, 0 }
  0x13   : > { %s327_s23 = scalar_select %p326_p10, %s2094_s13, 7 }
  0x14   : > { %334 = sbr.rel (%p1597_p11) target bundleno = 154 (0x9a), region = 60  ;;  %s2007_s21 = smov (!%p1597_p11), 120  }
  0x15   : > { %s1654_s24 = sshll.u32 %s327_s23, 5  ;;  %s2008_s26 = smov (!%p1597_p11), 104  }
  0x16   : > { %s2129_s27 = scalar_lea.vmem %s2600_s0, %s1654_s24 }
  0x19   : > { %v346_v0 = vld [vmem:[%s2601_s1 + $0x10] sm:$0xff]  ;;  %v344_v1 = vld [vmem:[%s2601_s1] sm:$0xff]  ;;  %v347_v2 = vld [vmem:[%s2601_s1 + $0x18] sm:$0xff]  ;;  %vm339_vm0 = vcmask 64512   ;;  %vm364_vm1 = vcmask 130048  }
  0x1a   : > { %356 = vrot.lane.b32.xlu1 %v346_v0, %s2007_s21  ;;  %352 = vrot.lane.b32.xlu0 %v344_v1, %s2007_s21  ;;  %v345_v3 = vld [vmem:[%s2601_s1 + $0x8] sm:$0xff]  ;;  %340 = vst.msk [vmem:[#allocation2] sm:$0xff] %vm339_vm0, %v344_v1  ;;  %342 = vst.msk [vmem:[#allocation2 + $0x10] sm:$0xff] %vm339_vm0, %v346_v0 }
  0x1b   : > { %341 = vst.msk [vmem:[#allocation2 + $0x8] sm:$0xff] %vm339_vm0, %v345_v3  ;;  %343 = vst.msk [vmem:[#allocation2 + $0x18] sm:$0xff] %vm339_vm0, %v347_v2 }
  0x1e   : > { %358 = vrot.lane.b32.xlu1 %v347_v2, %s2007_s21  ;;  %354 = vrot.lane.b32.xlu0 %v345_v3, %s2007_s21 }
  0x22   : > { %379 = vrot.lane.b32.xlu1 %v345_v3, %s2008_s26  ;;  %377 = vrot.lane.b32.xlu0 %v344_v1, %s2008_s26 }
  0x26   : > { %383 = vrot.lane.b32.xlu1 %v347_v2, %s2008_s26  ;;  %381 = vrot.lane.b32.xlu0 %v346_v0, %s2008_s26 }
  0x8c   : > { %v357_v4 = vpop.permute.xlu1 %356  ;;  %v353_v5 = vpop.permute.xlu0 %352 }
  0x8d   : > { %367 = vst.msk [vmem:[#allocation3 + $0x10] sm:$0xff] %vm364_vm1, %v357_v4  ;;  %365 = vst.msk [vmem:[#allocation3] sm:$0xff] %vm364_vm1, %v353_v5 }
  0x90   : > { %v359_v6 = vpop.permute.xlu1 %358  ;;  %v355_v7 = vpop.permute.xlu0 %354 }
  0x91   : > { %368 = vst.msk [vmem:[#allocation3 + $0x18] sm:$0xff] %vm364_vm1, %v359_v6  ;;  %366 = vst.msk [vmem:[#allocation3 + $0x8] sm:$0xff] %vm364_vm1, %v355_v7 }
  0x94   : > { %v380_v8 = vpop.permute.xlu1 %379  ;;  %v378_v9 = vpop.permute.xlu0 %377 }
  0x95   : > { %390 = vst.msk [vmem:[#allocation4 + $0x8] sm:$0xff] %vm364_vm1, %v380_v8  ;;  %389 = vst.msk [vmem:[#allocation4] sm:$0xff] %vm364_vm1, %v378_v9 }
  0x98   : > { %v384_v10 = vpop.permute.xlu1 %383  ;;  %v382_v11 = vpop.permute.xlu0 %381 }
  0x99   : > { %392 = vst.msk [vmem:[#allocation4 + $0x18] sm:$0xff] %vm364_vm1, %v384_v10  ;;  %391 = vst.msk [vmem:[#allocation4 + $0x10] sm:$0xff] %vm364_vm1, %v382_v11 }
  0x9a PF: > { %v396_v12 = vld [vmem:[#allocation2 + $0x18] sm:$0xff]  ;;  %v395_v13 = vld [vmem:[#allocation2 + $0x10] sm:$0xff]  ;;  %vm429_vm2 = vcmask 261120   ;;  %v397_v14 = vld [vmem:[%s2602_s2] sm:$0xff]  ;;  %vm948_vm3 = vcmask 1040384   ;;  %s2009_s24 = smov 1  }
  0x9b   : > { %1755 = vmatprep.subr.mxu0 %v396_v12  ;;  %v394_v15 = vld [vmem:[#allocation2 + $0x8] sm:$0xff]  ;;  %1763 = vmatprep.mubr.msk.f32.mxu0 %vm429_vm2, %v397_v14  ;;  %v393_v16 = vld [vmem:[#allocation2] sm:$0xff]  ;;  %v399_v18 = vld [vmem:[%s2602_s2 + $0x10] sm:$0xff]  ;;  %s2010_s26 = smov 4   ;;  %vm928_vm4 = vcmask 7168   ;;  %vm935_vm5 = vcmask 72704  }
  0x9c   : > { %1756 = vmatpush3.msra.mxu0 %v396_v12  ;;  %v398_v17 = vld [vmem:[%s2602_s2 + $0x8] sm:$0xff]  ;;  %v400_v19 = vld [vmem:[%s2602_s2 + $0x18] sm:$0xff]  ;;  %v401_v20 = vld [vmem:[%s2602_s2 + $0x20] sm:$0xff]  ;;  %vm1089_vm6 = vcmask 1043456   ;;  %vm1061_vm7 = vcmask 31744   ;;  %vm1076_vm8 = vcmask 162816  }
  0x9d   : > { %1757 = vmatprep.subr.mxu0 %v395_v13  ;;  %v402_v21 = vld [vmem:[%s2602_s2 + $0x28] sm:$0xff]  ;;  %v403_v22 = vld [vmem:[%s2602_s2 + $0x30] sm:$0xff]  ;;  %v404_v23 = vld [vmem:[%s2602_s2 + $0x38] sm:$0xff]  ;;  %s2011_s22 = smov 96   ;;  %s2014_s17 = smov 80   ;;  %vm1310_vm9 = vcmask 130048  }
  0x9e   : > { %1758 = vmatpush3.msra.mxu0 %v395_v13  ;;  %v405_v24 = vld [vmem:[%s2602_s2 + $0x40] sm:$0xff]  ;;  %v406_v25 = vld [vmem:[%s2602_s2 + $0x48] sm:$0xff]  ;;  %v407_v26 = vld [vmem:[%s2602_s2 + $0x50] sm:$0xff]  ;;  %s2016_s23 = smov 105   ;;  %s2017_s25 = smov 41   ;;  %vm1499_vm10 = vcmask 203776  }
  0x9f   : > { %1759 = vmatprep.subr.mxu0 %v394_v15  ;;  %v408_v27 = vld [vmem:[%s2602_s2 + $0x58] sm:$0xff]  ;;  %v409_v28 = vld [vmem:[%s2602_s2 + $0x60] sm:$0xff]  ;;  %v410_v29 = vld [vmem:[%s2602_s2 + $0x68] sm:$0xff]  ;;  %vm1504_vm11 = vcmask 334848   ;;  %vm1509_vm12 = vcmask 400384   ;;  %s1528_s21 = sshll.u32 %s2131_s28, 4  ;;  %s2550_s21 = int_to_ptr.vmem [resolvable:$true] %s1528_s21 }
  0xa0   : > { %1760 = vmatpush3.msra.mxu0 %v394_v15  ;;  %v411_v30 = vld [vmem:[%s2602_s2 + $0x70] sm:$0xff]  ;;  %v412_v31 = vld [vmem:[%s2602_s2 + $0x78] sm:$0xff]  ;;  %v413_v32 = vld [vmem:[%s2602_s2 + $0x80] sm:$0xff]  ;;  %s2613_s16 = sand.u32 1, %s1997_s10  }
  0xa1   : > { %1761 = vmatprep.subr.mxu0 %v393_v16  ;;  %v414_v33 = vld [vmem:[%s2602_s2 + $0x88] sm:$0xff]  ;;  %v415_v34 = vld [vmem:[%s2602_s2 + $0x90] sm:$0xff]  ;;  %v416_v35 = vld [vmem:[%s2602_s2 + $0x98] sm:$0xff] }
  0xa2   : > { %1762 = vmatpush3.msra.mxu0 %v393_v16  ;;  %v417_v36 = vld [vmem:[%s2602_s2 + $0xa0] sm:$0xff]  ;;  %v418_v37 = vld [vmem:[%s2602_s2 + $0xa8] sm:$0xff]  ;;  %v419_v38 = vld [vmem:[%s2602_s2 + $0xb0] sm:$0xff] }
  0xa3   : > { %1764 = vmatmul.mubr.msk.f32.vlgmr.msra.gmra.mxu0 %vm429_vm2, %v398_v17  ;;  %v420_v39 = vld [vmem:[%s2602_s2 + $0xb8] sm:$0xff]  ;;  %v421_v40 = vld [vmem:[%s2602_s2 + $0xc0] sm:$0xff]  ;;  %v422_v41 = vld [vmem:[%s2602_s2 + $0xc8] sm:$0xff] }
  0xa4   : > { %1766 = vmatprep.mubr.msk.f32.mxu0 %vm429_vm2, %v399_v18  ;;  %v423_v42 = vld [vmem:[%s2602_s2 + $0xd0] sm:$0xff]  ;;  %v424_v43 = vld [vmem:[%s2602_s2 + $0xd8] sm:$0xff]  ;;  %v425_v44 = vld [vmem:[%s2602_s2 + $0xe0] sm:$0xff] }
  0xa5   : > { %v426_v45 = vld [vmem:[%s2602_s2 + $0xe8] sm:$0xff]  ;;  %v427_v46 = vld [vmem:[%s2602_s2 + $0xf0] sm:$0xff]  ;;  %v428_v47 = vld [vmem:[%s2602_s2 + $0xf8] sm:$0xff] }
  0xa6   : > { %v752_v48 = vld [vmem:[%s2603_s3 + $0x8] sm:$0xff]  ;;  %v790_v15 = vld [vmem:[%s2604_s4 + $0xf8] sm:$0xff]  ;;  %v789_v18 = vld [vmem:[%s2604_s4 + $0xf0] sm:$0xff] }
  0xa7   : > { %1767 = vmatmul.mubr.msk.f32.gmra.mxu0 %vm429_vm2, %v400_v19  ;;  %887 = vmatprep.mubr.f32.mxu1 %v752_v48  ;;  %v774_v16 = vld [vmem:[%s2604_s4 + $0x78] sm:$0xff]  ;;  %v773_v19 = vld [vmem:[%s2604_s4 + $0x70] sm:$0xff] }
  0xa8   : > { %1769 = vmatprep.mubr.msk.f32.mxu0 %vm429_vm2, %v401_v20  ;;  %v766_v48 = vld [vmem:[%s2604_s4 + $0x38] sm:$0xff] }
  0xab   : > { %1770 = vmatmul.mubr.msk.f32.gmra.mxu0 %vm429_vm2, %v402_v21 }
  0xac   : > { %1772 = vmatprep.mubr.msk.f32.mxu0 %vm429_vm2, %v403_v22  ;;  %v788_v22 = vld [vmem:[%s2604_s4 + $0xe8] sm:$0xff] }
  0xaf   : > { %1773 = vmatmul.mubr.msk.f32.gmra.mxu0 %vm429_vm2, %v404_v23 }
  0xb0   : > { %1775 = vmatprep.mubr.msk.f32.mxu0 %vm429_vm2, %v405_v24  ;;  %v772_v24 = vld [vmem:[%s2604_s4 + $0x68] sm:$0xff] }
  0xb3   : > { %1776 = vmatmul.mubr.msk.f32.gmra.mxu0 %vm429_vm2, %v406_v25 }
  0xb4   : > { %1778 = vmatprep.mubr.msk.f32.mxu0 %vm429_vm2, %v407_v26 }
  0xb7   : > { %1779 = vmatmul.mubr.msk.f32.gmra.mxu0 %vm429_vm2, %v408_v27  ;;  %v787_v27 = vld [vmem:[%s2604_s4 + $0xe0] sm:$0xff] }
  0xb8   : > { %1781 = vmatprep.mubr.msk.f32.mxu0 %vm429_vm2, %v409_v28  ;;  %v771_v28 = vld [vmem:[%s2604_s4 + $0x60] sm:$0xff] }
  0xbb   : > { %1782 = vmatmul.mubr.msk.f32.gmra.mxu0 %vm429_vm2, %v410_v29 }
  0xbc   : > { %1784 = vmatprep.mubr.msk.f32.mxu0 %vm429_vm2, %v411_v30 }
  0xbf   : > { %1785 = vmatmul.mubr.msk.f32.gmra.mxu0 %vm429_vm2, %v412_v31  ;;  %v786_v31 = vld [vmem:[%s2604_s4 + $0xd8] sm:$0xff] }
  0xc0   : > { %1787 = vmatprep.mubr.msk.f32.mxu0 %vm429_vm2, %v413_v32  ;;  %v770_v32 = vld [vmem:[%s2604_s4 + $0x58] sm:$0xff] }
  0xc3   : > { %1788 = vmatmul.mubr.msk.f32.gmra.mxu0 %vm429_vm2, %v414_v33 }
  0xc4   : > { %1790 = vmatprep.mubr.msk.f32.mxu0 %vm429_vm2, %v415_v34 }
  0xc7   : > { %1791 = vmatmul.mubr.msk.f32.gmra.mxu0 %vm429_vm2, %v416_v35  ;;  %v785_v35 = vld [vmem:[%s2604_s4 + $0xd0] sm:$0xff] }
  0xc8   : > { %1793 = vmatprep.mubr.msk.f32.mxu0 %vm429_vm2, %v417_v36  ;;  %v769_v36 = vld [vmem:[%s2604_s4 + $0x50] sm:$0xff] }
  0xcb   : > { %1794 = vmatmul.mubr.msk.f32.gmra.mxu0 %vm429_vm2, %v418_v37 }
  0xcc   : > { %1796 = vmatprep.mubr.msk.f32.mxu0 %vm429_vm2, %v419_v38 }
  0xcf   : > { %1797 = vmatmul.mubr.msk.f32.gmra.mxu0 %vm429_vm2, %v420_v39  ;;  %v784_v39 = vld [vmem:[%s2604_s4 + $0xc8] sm:$0xff] }
  0xd0   : > { %1799 = vmatprep.mubr.msk.f32.mxu0 %vm429_vm2, %v421_v40  ;;  %v768_v40 = vld [vmem:[%s2604_s4 + $0x48] sm:$0xff] }
  0xd3   : > { %1800 = vmatmul.mubr.msk.f32.gmra.mxu0 %vm429_vm2, %v422_v41 }
  0xd4   : > { %1802 = vmatprep.mubr.msk.f32.mxu0 %vm429_vm2, %v423_v42 }
  0xd7   : > { %1803 = vmatmul.mubr.msk.f32.gmra.mxu0 %vm429_vm2, %v424_v43  ;;  %v783_v43 = vld [vmem:[%s2604_s4 + $0xc0] sm:$0xff] }
  0xd8   : > { %1805 = vmatprep.mubr.msk.f32.mxu0 %vm429_vm2, %v425_v44  ;;  %v767_v44 = vld [vmem:[%s2604_s4 + $0x40] sm:$0xff] }
  0xdb   : > { %1806 = vmatmul.mubr.msk.f32.gmra.mxu0 %vm429_vm2, %v426_v45 }
  0xdc   : > { %1808 = vmatprep.mubr.msk.f32.mxu0 %vm429_vm2, %v427_v46 }
  0xdf   : > { %1809 = vmatmul.mubr.msk.f32.gmra.mxu0 %vm429_vm2, %v428_v47  ;;  %v782_v47 = vld [vmem:[%s2604_s4 + $0xb8] sm:$0xff] }
 0x163   : > { %v2285_v49 = vpop.f32.mrf.mxu0 }
 0x165   : > { %v2287_v50 = vpop.f32.mrf.mxu0 }
 0x167   : > { %v2289_v51 = vpop.f32.mrf.mxu0 }
 0x169   : > { %v2291_v52 = vpop.f32.mrf.mxu0 }
 0x16b   : > { %v2293_v53 = vpop.f32.mrf.mxu0 }
 0x16d   : > { %v2295_v54 = vpop.f32.mrf.mxu0 }
 0x16f   : > { %v2297_v55 = vpop.f32.mrf.mxu0 }
 0x171   : > { %v2299_v56 = vpop.f32.mrf.mxu0 }
 0x173   : > { %v2301_v57 = vpop.f32.mrf.mxu0 }
 0x174   : > { %v800_v46 = vmul.f32 %v2301_v57, %v768_v40  ;;  %v765_v57 = vld [vmem:[%s2604_s4 + $0x30] sm:$0xff]  ;;  %v1042_v40 = vld [vmem:[#allocation4 + $0x8] sm:$0xff] }
 0x175   : > { %v2303_v58 = vpop.f32.mrf.mxu0 }
 0x177   : > { %v1780_v59 = vpop.f32.mrf.mxu0 }
 0x178   : > { %v802_v38 = vmul.f32 %v1780_v59, %v770_v32 }
 0x179   : > { %v642_v60 = vpop.f32.mrf.mxu0 }
 0x17a   : > { %v801_v42 = vmul.f32 %v769_v36, %v642_v60  ;;  %v799_v60 = vmul.f32 %v767_v44, %v2303_v58  ;;  %v764_v58 = vld [vmem:[%s2604_s4 + $0x28] sm:$0xff] }
 0x17b   : > { %v1783_v61 = vpop.f32.mrf.mxu0 }
 0x17c   : > { %v804_v30 = vmul.f32 %v1783_v61, %v772_v24  ;;  %v781_v61 = vld [vmem:[%s2604_s4 + $0xb0] sm:$0xff]  ;;  %v934_v24 = vld [vmem:[%s2605_s5 + $0x8] sm:$0x1] }
 0x17d   : > { %v652_v62 = vpop.f32.mrf.mxu0 }
 0x17e   : > { %v803_v34 = vmul.f32 %v771_v28, %v652_v62 }
 0x17f   : > { %v1786_v63 = vpop.f32.mrf.mxu0 }
 0x180   : > { %v806_v21 = vmul.f32 %v1786_v63, %v774_v16  ;;  %v798_v63 = vmul.f32 %v2297_v55, %v766_v48  ;;  %v763_v55 = vld [vmem:[%s2604_s4 + $0x20] sm:$0xff]  ;;  %v910_v48 = vld [vmem:[%s2129_s27 + $0x10] sm:$0xff] }
 0x181   : > { %v662_v0 = vpop.f32.mrf.mxu0 }
 0x182   : > { %v805_v26 = vmul.f32 %v773_v19, %v662_v0  ;;  %v780_v0 = vld [vmem:[%s2604_s4 + $0xa8] sm:$0xff] }
 0x183   : > { %v2305_v1 = vpop.f32.mrf.mxu0 }
 0x185   : > { %v2307_v2 = vpop.f32.mrf.mxu0 }
 0x187   : > { %v2309_v3 = vpop.f32.mrf.mxu0 }
 0x189   : > { %v2311_v4 = vpop.f32.mrf.mxu0 }
 0x18b   : > { %v2313_v5 = vpop.f32.mrf.mxu0 }
 0x18d   : > { %v2315_v6 = vpop.f32.mrf.mxu0 }
 0x18f   : > { %v1798_v7 = vpop.f32.mrf.mxu0 }
 0x190   : > { %v814_v62 = vmul.f32 %v1798_v7, %v782_v47  ;;  %v779_v7 = vld [vmem:[%s2604_s4 + $0xa0] sm:$0xff] }
 0x191   : > { %v2317_v8 = vpop.f32.mrf.mxu0 }
 0x193   : > { %v1801_v9 = vpop.f32.mrf.mxu0 }
 0x194   : > { %v816_v45 = vmul.f32 %v1801_v9, %v784_v39  ;;  %v813_v9 = vmul.f32 %v781_v61, %v2317_v8  ;;  %v778_v8 = vld [vmem:[%s2604_s4 + $0x98] sm:$0xff] }
 0x195   : > { %v712_v10 = vpop.f32.mrf.mxu0  ;;  %v911_v61 = vld [vmem:[%s2129_s27 + $0x18] sm:$0xff] }
 0x196   : > { %v815_v59 = vmul.f32 %v783_v43, %v712_v10  ;;  %v797_v10 = vmul.f32 %v765_v57, %v2299_v56  ;;  %v762_v56 = vld [vmem:[%s2604_s4 + $0x18] sm:$0xff] }
 0x197   : > { %v1804_v11 = vpop.f32.mrf.mxu0  ;;  %v794_v16 = vmul.f32 %v2289_v51, %v762_v56  ;;  %v759_v51 = vld [vmem:[%s2604_s4] sm:$0xff] }
 0x198   : > { %v818_v37 = vmul.f32 %v1804_v11, %v786_v31  ;;  %v812_v11 = vmul.f32 %v2313_v5, %v780_v0  ;;  %v777_v5 = vld [vmem:[%s2604_s4 + $0x90] sm:$0xff]  ;;  %v1067_v0 = vld [vmem:[%s2606_s6 + $0x8] sm:$0xff] }
 0x199   : > { %v722_v12 = vpop.f32.mrf.mxu0 }
 0x19a   : > { %v817_v41 = vmul.f32 %v785_v35, %v722_v12  ;;  %v796_v12 = vmul.f32 %v2293_v53, %v764_v58  ;;  %v761_v53 = vld [vmem:[%s2604_s4 + $0x10] sm:$0xff]  ;;  %v1066_v58 = vld [vmem:[%s2606_s6] sm:$0xff] }
 0x19b   : > { %v1807_v13 = vpop.f32.mrf.mxu0 }
 0x19c   : > { %v820_v29 = vmul.f32 %v1807_v13, %v788_v22  ;;  %v811_v13 = vmul.f32 %v779_v7, %v2315_v6  ;;  %v776_v6 = vld [vmem:[%s2604_s4 + $0x88] sm:$0xff]  ;;  %v754_v22 = vld [vmem:[%s2603_s3 + $0x18] sm:$0xff] }
 0x19d   : > { %v732_v14 = vpop.f32.mrf.mxu0  ;;  %v808_v19 = vmul.f32 %v2305_v1, %v776_v6  ;;  %v755_v1 = vld [vmem:[%s2603_s3 + $0x20] sm:$0xff] }
 0x19e   : > { %v819_v33 = vmul.f32 %v787_v27, %v732_v14  ;;  %v795_v14 = vmul.f32 %v763_v55, %v2295_v54  ;;  %v760_v54 = vld [vmem:[%s2604_s4 + $0x8] sm:$0xff] }
 0x19f   : > { %v1810_v17 = vpop.f32.mrf.mxu0 }
 0x1a0   : > { %v822_v20 = vmul.f32 %v1810_v17, %v790_v15  ;;  %v810_v15 = vmul.f32 %v2309_v3, %v778_v8  ;;  %v809_v17 = vmul.f32 %v777_v5, %v2311_v4  ;;  %v775_v3 = vld [vmem:[%s2604_s4 + $0x80] sm:$0xff] }
 0x1a1   : > { %v742_v23 = vpop.f32.mrf.mxu0  ;;  %v807_v4 = vmul.f32 %v775_v3, %v2307_v2  ;;  %v758_v2 = vld [vmem:[%s2603_s3 + $0x38] sm:$0xff] }
 0x1a2   : > { %v821_v25 = vmul.f32 %v789_v18, %v742_v23  ;;  %1692 = vmatprep.subr.mxu1 %v822_v20  ;;  %v793_v18 = vmul.f32 %v761_v53, %v2291_v52  ;;  %v792_v20 = vmul.f32 %v2285_v49, %v760_v54  ;;  %v791_v52 = vmul.f32 %v759_v51, %v2287_v50  ;;  %v753_v49 = vld [vmem:[%s2603_s3 + $0x10] sm:$0xff]  ;;  %v756_v50 = vld [vmem:[%s2603_s3 + $0x28] sm:$0xff] }
 0x1a3   : > { %1693 = vmatpush3.msra.mxu1 %v806_v21  ;;  %v751_v21 = vld [vmem:[%s2603_s3] sm:$0xff]  ;;  %v757_v23 = vld [vmem:[%s2603_s3 + $0x30] sm:$0xff] }
 0x1a4   : > { %1694 = vmatprep.subr.mxu1 %v821_v25  ;;  %v933_v25 = vld [vmem:[%s2605_s5] sm:$0xff] }
 0x1a5   : > { %1695 = vmatpush3.msra.mxu1 %v805_v26 }
 0x1a6   : > { %1696 = vmatprep.subr.mxu1 %v820_v29 }
 0x1a7   : > { %1697 = vmatpush3.msra.mxu1 %v804_v30 }
 0x1a8   : > { %1698 = vmatprep.subr.mxu1 %v819_v33 }
 0x1a9   : > { %1699 = vmatpush3.msra.mxu1 %v803_v34  ;;  %v1041_v34 = vld [vmem:[#allocation4] sm:$0xff] }
 0x1aa   : > { %1700 = vmatprep.subr.mxu1 %v818_v37 }
 0x1ab   : > { %1701 = vmatpush3.msra.mxu1 %v802_v38  ;;  %v1043_v38 = vld [vmem:[#allocation4 + $0x10] sm:$0xff] }
 0x1ac   : > { %1702 = vmatprep.subr.mxu1 %v817_v41  ;;  %v1044_v41 = vld [vmem:[#allocation4 + $0x18] sm:$0xff] }
 0x1ad   : > { %1703 = vmatpush3.msra.mxu1 %v801_v42  ;;  %v908_v42 = vld [vmem:[%s2129_s27] sm:$0xff] }
 0x1ae   : > { %1704 = vmatprep.subr.mxu1 %v816_v45  ;;  %v909_v45 = vld [vmem:[%s2129_s27 + $0x8] sm:$0xff]  ;;  %s2015_s27 = smov 121  }
 0x1af   : > { %1705 = vmatpush3.msra.mxu1 %v800_v46 }
 0x1b0   : > { %1706 = vmatprep.subr.mxu1 %v815_v59 }
 0x1b1   : > { %1707 = vmatpush3.msra.mxu1 %v799_v60 }
 0x1b2   : > { %1708 = vmatprep.subr.mxu1 %v814_v62 }
 0x1b3   : > { %1709 = vmatpush3.msra.mxu1 %v798_v63  ;;  %v1068_v63 = vld [vmem:[%s2606_s6 + $0x10] sm:$0xf] }
 0x1b4   : > { %1710 = vmatprep.subr.mxu1 %v813_v9 }
 0x1b5   : > { %1711 = vmatpush3.msra.mxu1 %v797_v10 }
 0x1b6   : > { %1712 = vmatprep.subr.mxu1 %v812_v11 }
 0x1b7   : > { %1713 = vmatpush3.msra.mxu1 %v796_v12 }
 0x1b8   : > { %1714 = vmatprep.subr.mxu1 %v811_v13 }
 0x1b9   : > { %1715 = vmatpush3.msra.mxu1 %v795_v14 }
 0x1ba   : > { %1716 = vmatprep.subr.mxu1 %v810_v15 }
 0x1bb   : > { %1717 = vmatpush3.msra.mxu1 %v794_v16 }
 0x1bc   : > { %1718 = vmatprep.subr.mxu1 %v809_v17  ;;  %v1635_v17 = vld [vmem:[%s2607_s7] ss:$0 sm:$0xff] }
 0x1bd   : > { %1719 = vmatpush3.msra.mxu1 %v793_v18 }
 0x1be   : > { %1720 = vmatprep.subr.mxu1 %v808_v19 }
 0x1bf   : > { %1721 = vmatpush3.msra.mxu1 %v792_v20 }
 0x1c0   : > { %1722 = vmatprep.subr.mxu1 %v807_v4 }
 0x1c1   : > { %1723 = vmatpush3.msra.mxu1 %v791_v52 }
 0x1c2   : > { %888 = vmatmul.mubr.f32.vlgmr.msra.gmra.mxu1 %v751_v21  ;;  %1811 = vmatprep.subr.msk.mxu1 %vm948_vm3, %v934_v24 }
 0x1c3   : > { %892 = vmatprep.mubr.f32.mxu1 %v754_v22  ;;  %1812 = vmatpush3.msk.msra.mxu1 %vm948_vm3, %v934_v24  ;;  %v1209_v24 = vld [vmem:[#allocation3 + $0x18] sm:$0xff] }
 0x1c4   : > { %1813 = vmatprep.subr.mxu1 %v933_v25 }
 0x1c5   : > { %1814 = vmatpush3.msra.mxu1 %v933_v25  ;;  %v1208_v25 = vld [vmem:[#allocation3 + $0x10] sm:$0xff] }
 0x1c6   : > { %893 = vmatmul.mubr.f32.gmra.mxu1 %v753_v49  ;;  %1821 = vmatprep.subr.msk.mxu1 %vm1089_vm6, %v1068_v63 }
 0x1c7   : > { %897 = vmatprep.mubr.f32.mxu1 %v756_v50 }
 0x1ca   : > { %898 = vmatmul.mubr.f32.gmra.mxu1 %v755_v1  ;;  %v1207_v1 = vld [vmem:[#allocation3 + $0x8] sm:$0xff] }
 0x1cb   : > { %902 = vmatprep.mubr.f32.mxu1 %v758_v2 }
 0x1ce   : > { %903 = vmatmul.mubr.f32.gmra.mxu1 %v757_v23  ;;  %v1206_v23 = vld [vmem:[#allocation3] sm:$0xff] }
 0x282   : > { %v1724_v26 = vpop.f32.mrf.mxu1 }
 0x284   : > { %v1725_v27 = vpop.f32.mrf.mxu1 }
 0x285   : > { %v2459_v28 = vadd.f32 %v1725_v27, %v1724_v26 }
 0x286   : > { %v1727_v29 = vpop.f32.mrf.mxu1 }
 0x287   : > { %916 = vrot.lane.b32.xlu0 %v2459_v28, %s2009_s24 }
 0x288   : > { %v1728_v30 = vpop.f32.mrf.mxu1 }
 0x289   : > { %v2462_v31 = vadd.f32 %v1728_v30, %v1727_v29 }
 0x28a   : > { %v1730_v32 = vpop.f32.mrf.mxu1 }
 0x28b   : > { %918 = vrot.lane.b32.xlu0 %v2462_v31, %s2009_s24 }
 0x28c   : > { %v1731_v33 = vpop.f32.mrf.mxu1 }
 0x28d   : > { %v2465_v35 = vadd.f32 %v1731_v33, %v1730_v32 }
 0x28e   : > { %v1733_v36 = vpop.f32.mrf.mxu1 }
 0x28f   : > { %920 = vrot.lane.b32.xlu1 %v2465_v35, %s2009_s24  ;;  %1049 = vrot.lane.b32.xlu0 %v1041_v34, %s2010_s26 }
 0x290   : > { %v1734_v37 = vpop.f32.mrf.mxu1 }
 0x291   : > { %v2468_v39 = vadd.f32 %v1734_v37, %v1733_v36 }
 0x293   : > { %922 = vrot.lane.b32.xlu1 %v2468_v39, %s2009_s24  ;;  %1053 = vrot.lane.b32.xlu0 %v1043_v38, %s2010_s26  ;;  %s2012_s24 = smov 16  }
 0x297   : > { %1051 = vrot.lane.b32.xlu1 %v1042_v40, %s2010_s26 }
 0x29b   : > { %1055 = vrot.lane.b32.xlu1 %v1044_v41, %s2010_s26  ;;  %s2013_s26 = smov 32  }
 0x2f9   : > { %v917_v43 = vpop.permute.xlu0 %916 }
 0x2fa   : > { %v929_v44 = vsel %vm928_vm4, %v908_v42, %v917_v43 }
 0x2fb   : > { %1815 = vmatprep.mubr.msk.f32.mxu1 %vm935_vm5, %v929_v44 }
 0x2fd   : > { %v919_v46 = vpop.permute.xlu0 %918 }
 0x2fe   : > { %v930_v47 = vsel %vm928_vm4, %v909_v45, %v919_v46 }
 0x2ff   : > { %1816 = vmatmul.mubr.msk.f32.vlgmr.msra.gmra.mxu1 %vm935_vm5, %v930_v47 }
 0x300   : > { %1822 = vmatpush3.msk.msra.mxu1 %vm1089_vm6, %v1068_v63 }
 0x301   : > { %v921_v59 = vpop.permute.xlu1 %920  ;;  %1823 = vmatprep.subr.mxu1 %v1067_v0  ;;  %v1050_v11 = vpop.permute.xlu0 %1049 }
 0x302   : > { %v931_v60 = vsel %vm928_vm4, %v910_v48, %v921_v59  ;;  %1824 = vmatpush3.msra.mxu1 %v1067_v0 }
 0x303   : > { %1818 = vmatprep.mubr.msk.f32.mxu1 %vm935_vm5, %v931_v60  ;;  %1825 = vmatprep.subr.mxu1 %v1066_v58 }
 0x304   : > { %1826 = vmatpush3.msra.mxu1 %v1066_v58 }
 0x305   : > { %v923_v57 = vpop.permute.xlu1 %922  ;;  %v1054_v5 = vpop.permute.xlu0 %1053 }
 0x306   : > { %v932_v62 = vsel %vm928_vm4, %v911_v61, %v923_v57 }
 0x307   : > { %1819 = vmatmul.mubr.msk.f32.gmra.mxu1 %vm935_vm5, %v932_v62 }
 0x309   : > { %v1052_v8 = vpop.permute.xlu1 %1051 }
 0x30d   : > { %v1056_v15 = vpop.permute.xlu1 %1055 }
 0x3bf   : > { %v1817_v9 = vpop.f32.mrf.mxu1 }
 0x3c0   : > { %1897 = vtanh.f32 %v1817_v9 }
 0x3c1   : > { %v1018_v10 = vpop.f32.mrf.mxu1 }
 0x3c2   : > { %1899 = vtanh.f32 %v1018_v10 }
 0x3c7   : > { %v1820_v7 = vpop.f32.mrf.mxu1 }
 0x3c8   : > { %1901 = vtanh.f32 %v1820_v7 }
 0x3c9   : > { %v1028_v55 = vpop.f32.mrf.mxu1 }
 0x3ca   : > { %1903 = vtanh.f32 %v1028_v55 }
 0x3cd   : > { %v1898_v12 = vpop.eup %1897 }
 0x3ce   : > { %v1063_v14 = vsel %vm1061_vm7, %v1898_v12, %v1052_v8 }
 0x3cf   : > { %v1900_v56 = vpop.eup %1899 }
 0x3d0   : > { %v1062_v13 = vsel %vm1061_vm7, %v1900_v56, %v1050_v11 }
 0x3d1   : > { %1827 = vmatprep.mubr.msk.f32.mxu1 %vm1076_vm8, %v1062_v13 }
 0x3d2   : > { %1828 = vmatmul.mubr.msk.f32.vlgmr.msra.gmra.mxu1 %vm1076_vm8, %v1063_v14 }
 0x3d5   : > { %v1902_v53 = vpop.eup %1901 }
 0x3d6   : > { %v1065_v54 = vsel %vm1061_vm7, %v1902_v53, %v1056_v15 }
 0x3d7   : > { %v1904_v16 = vpop.eup %1903 }
 0x3d8   : > { %v1064_v6 = vsel %vm1061_vm7, %v1904_v16, %v1054_v5 }
 0x3d9   : > { %1830 = vmatprep.mubr.msk.f32.mxu1 %vm1076_vm8, %v1064_v6 }
 0x3da   : > { %1831 = vmatmul.mubr.msk.f32.gmra.mxu1 %vm1076_vm8, %v1065_v54 }
 0x492   : > { %v1829_v18 = vpop.f32.mrf.mxu1 }
 0x493   : > { %v1165_v3 = vadd.f32 %v1829_v18, %v1635_v17  ;;  %v1336_v18 = vld [vmem:[%s2608_s8 + $0x8] sm:$0xff] }
 0x494   : > { %v1159_v51 = vpop.f32.mrf.mxu1  ;;  %1833 = vmatprep.subr.mxu1 %v1336_v18 }
 0x495   : > { %1905 = vtanh.f32 %v1165_v3  ;;  %v1160_v19 = vadd.f32 %v1635_v17, %v1159_v51  ;;  %v1642_v26 = vmul.f32 -1.442695, %v1165_v3  ;;  %1834 = vmatpush3.msra.mxu1 %v1336_v18  ;;  %v1335_v3 = vld [vmem:[%s2608_s8] sm:$0xff] }
 0x496   : > { %1835 = vmatprep.subr.mxu1 %v1335_v3 }
 0x497   : > { %1907 = vtanh.f32 %v1160_v19  ;;  %v1641_v27 = vmul.f32 -1.442695, %v1160_v19  ;;  %1836 = vmatpush3.msra.mxu1 %v1335_v3 }
 0x49a   : > { %v1832_v20 = vpop.f32.mrf.mxu1 }
 0x49b   : > { %v1175_v4 = vadd.f32 %v1832_v20, %v1635_v17 }
 0x49c   : > { %v1169_v52 = vpop.f32.mrf.mxu1 }
 0x49d   : > { %1909 = vtanh.f32 %v1175_v4  ;;  %v1170_v21 = vadd.f32 %v1635_v17, %v1169_v52  ;;  %v1644_v29 = vmul.f32 -1.442695, %v1175_v4 }
 0x49f   : > { %1911 = vtanh.f32 %v1170_v21  ;;  %v1643_v30 = vmul.f32 -1.442695, %v1170_v21 }
 0x4a0   : > { %1913 = vpow2.f32 %v1642_v26 }
 0x4a1   : > { %1915 = vpow2.f32 %v1641_v27 }
 0x4a2   : > { %v1906_v22 = vpop.eup %1905  ;;  %1917 = vpow2.f32 %v1644_v29 }
 0x4a3   : > { %1236 = vrot.lane.b32.xlu1 %v1906_v22, %s2011_s22  ;;  %1919 = vpow2.f32 %v1643_v30 }
 0x4a4   : > { %v1908_v49 = vpop.eup %1907 }
 0x4a5   : > { %1234 = vrot.lane.b32.xlu0 %v1908_v49, %s2011_s22 }
 0x4aa   : > { %v1910_v50 = vpop.eup %1909 }
 0x4ab   : > { %1240 = vrot.lane.b32.xlu1 %v1910_v50, %s2011_s22 }
 0x4ac   : > { %v1912_v2 = vpop.eup %1911 }
 0x4ad   : > { %1238 = vrot.lane.b32.xlu0 %v1912_v2, %s2011_s22  ;;  %v1914_v32 = vpop.eup %1913  ;;  %s2018_s22 = smov 112  }
 0x4ae   : > { %v1916_v33 = vpop.eup %1915  ;;  %v1191_v34 = vadd.f32 1.0, %v1914_v32 }
 0x4af   : > { %1216 = vrot.lane.b32.xlu1 %v1207_v1, %s2012_s24  ;;  %v1190_v36 = vadd.f32 1.0, %v1916_v33  ;;  %v1918_v37 = vpop.eup %1917 }
 0x4b0   : > { %1921 = vrcp.f32 %v1191_v34  ;;  %v1920_v38 = vpop.eup %1919  ;;  %v1193_v40 = vadd.f32 1.0, %v1918_v37 }
 0x4b1   : > { %1214 = vrot.lane.b32.xlu0 %v1206_v23, %s2012_s24  ;;  %1923 = vrcp.f32 %v1190_v36  ;;  %v1192_v41 = vadd.f32 1.0, %v1920_v38 }
 0x4b2   : > { %1925 = vrcp.f32 %v1193_v40 }
 0x4b3   : > { %1220 = vrot.lane.b32.xlu1 %v1209_v24, %s2012_s24  ;;  %1927 = vrcp.f32 %v1192_v41 }
 0x4b5   : > { %1218 = vrot.lane.b32.xlu0 %v1208_v25, %s2012_s24 }
 0x4bd   : > { %v1922_v42 = vpop.eup %1921 }
 0x4be   : > { %v1924_v45 = vpop.eup %1923 }
 0x4bf   : > { %v1926_v48 = vpop.eup %1925 }
 0x4c0   : > { %v1928_v61 = vpop.eup %1927 }
 0x515   : > { %v1237_v43 = vpop.permute.xlu1 %1236 }
 0x516   : > { %v1247_v44 = vmul.f32 %v1922_v42, %v1237_v43 }
 0x517   : > { %v1235_v46 = vpop.permute.xlu0 %1234 }
 0x518   : > { %1256 = vrot.lane.b32.xlu1 %v1247_v44, %s2012_s24  ;;  %v1246_v47 = vmul.f32 %v1924_v45, %v1235_v46 }
 0x51a   : > { %1254 = vrot.lane.b32.xlu0 %v1246_v47, %s2012_s24 }
 0x51d   : > { %v1241_v59 = vpop.permute.xlu1 %1240 }
 0x51e   : > { %v1249_v60 = vmul.f32 %v1926_v48, %v1241_v59 }
 0x51f   : > { %v1239_v57 = vpop.permute.xlu0 %1238 }
 0x520   : > { %1260 = vrot.lane.b32.xlu1 %v1249_v60, %s2012_s24  ;;  %v1248_v62 = vmul.f32 %v1928_v61, %v1239_v57 }
 0x521   : > { %v1217_v63 = vpop.permute.xlu1 %1216 }
 0x522   : > { %1258 = vrot.lane.b32.xlu0 %v1248_v62, %s2012_s24  ;;  %v1227_v9 = vmul.f32 %v1922_v42, %v1217_v63  ;;  %s2019_s24 = smov 127  }
 0x523   : > { %v1215_v0 = vpop.permute.xlu0 %1214 }
 0x524   : > { %v1226_v11 = vmul.f32 %v1924_v45, %v1215_v0 }
 0x525   : > { %v1221_v58 = vpop.permute.xlu1 %1220 }
 0x526   : > { %v1229_v56 = vmul.f32 %v1926_v48, %v1221_v58 }
 0x527   : > { %v1219_v10 = vpop.permute.xlu0 %1218 }
 0x528   : > { %v1228_v5 = vmul.f32 %v1928_v61, %v1219_v10 }
 0x58a   : > { %v1257_v7 = vpop.permute.xlu1 %1256 }
 0x58b   : > { %v1267_v55 = vadd.f32 %v1257_v7, %v1227_v9 }
 0x58c   : > { %v1255_v12 = vpop.permute.xlu0 %1254 }
 0x58d   : > { %1929 = vtanh.f32 %v1267_v55  ;;  %v1266_v8 = vadd.f32 %v1255_v12, %v1226_v11 }
 0x58f   : > { %1931 = vtanh.f32 %v1266_v8 }
 0x592   : > { %v1261_v13 = vpop.permute.xlu1 %1260 }
 0x593   : > { %v1269_v14 = vadd.f32 %v1261_v13, %v1229_v56 }
 0x594   : > { %v1259_v53 = vpop.permute.xlu0 %1258 }
 0x595   : > { %1933 = vtanh.f32 %v1269_v14  ;;  %v1268_v15 = vadd.f32 %v1259_v53, %v1228_v5 }
 0x597   : > { %1935 = vtanh.f32 %v1268_v15 }
 0x59a   : > { %v1930_v16 = vpop.eup %1929 }
 0x59b   : > { %1280 = vrot.lane.b32.xlu1 %v1930_v16, %s2013_s26 }
 0x59c   : > { %v1932_v6 = vpop.eup %1931 }
 0x59d   : > { %1278 = vrot.lane.b32.xlu0 %v1932_v6, %s2013_s26 }
 0x5a2   : > { %v1934_v54 = vpop.eup %1933 }
 0x5a3   : > { %1284 = vrot.lane.b32.xlu1 %v1934_v54, %s2013_s26 }
 0x5a4   : > { %v1936_v17 = vpop.eup %1935 }
 0x5a5   : > { %1282 = vrot.lane.b32.xlu0 %v1936_v17, %s2013_s26  ;;  %s1655_s26 = sshll.u32 %s2094_s13, 9 }
 0x5a6   : > { %s2548_s13 = scalar_lea.hbm %s2609_s9, %s1655_s26 }
 0x60d   : > { %v1281_v51 = vpop.permute.xlu1 %1280 }
 0x60e   : > { %v1291_v19 = vmul.f32 %v1922_v42, %v1281_v51 }
 0x60f   : > { %v1279_v20 = vpop.permute.xlu0 %1278 }
 0x610   : > { %1321 = vrot.lane.b32.xlu1 %v1291_v19, %s2014_s17  ;;  %v1290_v4 = vmul.f32 %v1924_v45, %v1279_v20 }
 0x612   : > { %1319 = vrot.lane.b32.xlu0 %v1290_v4, %s2014_s17 }
 0x615   : > { %v1285_v52 = vpop.permute.xlu1 %1284 }
 0x616   : > { %v1293_v21 = vmul.f32 %v1926_v48, %v1285_v52 }
 0x617   : > { %v1283_v22 = vpop.permute.xlu0 %1282 }
 0x618   : > { %1325 = vrot.lane.b32.xlu1 %v1293_v21, %s2014_s17  ;;  %v1292_v49 = vmul.f32 %v1928_v61, %v1283_v22 }
 0x61a   : > { %1323 = vrot.lane.b32.xlu0 %v1292_v49, %s2014_s17  ;;  %s2560_s17 = scalar_lea.sflag [#allocation6], %s2613_s16 }
 0x61c   : > { %1457 = vrot.lane.b32.xlu1 %v1267_v55, %s2015_s27 }
 0x61e   : > { %1455 = vrot.lane.b32.xlu0 %v1266_v8, %s2015_s27 }
 0x620   : > { %1461 = vrot.lane.b32.xlu1 %v1269_v14, %s2015_s27 }
 0x622   : > { %1459 = vrot.lane.b32.xlu0 %v1268_v15, %s2015_s27  ;;  %s1945_s27 = scalar_lea.vmem %s2550_s21, 512 }
 0x623   : > { %p1946_p12 = scmp.ne.s32.totalorder %s2550_s21, %s1945_s27 }
 0x624   : > { %1469 = vrot.lane.b32.xlu1 %v1291_v19, %s2016_s23 }
 0x625   : > { %p1947_p13 = pnand %p1946_p12, %p2111_p5 }
 0x626   : > { %1467 = vrot.lane.b32.xlu0 %v1290_v4, %s2016_s23 }
 0x627   : > { %p1948_p0 = pneg %p1947_p13 }
 0x628   : > { %1473 = vrot.lane.b32.xlu1 %v1293_v21, %s2016_s23 }
 0x62a   : > { %1479 = vrot.lane.b32.xlu0 %v2459_v28, %s2017_s25 }
 0x62c   : > { %1481 = vrot.lane.b32.xlu1 %v2462_v31, %s2017_s25 }
 0x62e   : > { %1483 = vrot.lane.b32.xlu0 %v2465_v35, %s2017_s25 }
 0x630   : > { %1485 = vrot.lane.b32.xlu1 %v2468_v39, %s2017_s25 }
 0x632   : > { %1298 = vrot.lane.b32.xlu0 %v1266_v8, %s2018_s22 }
 0x634   : > { %1300 = vrot.lane.b32.xlu1 %v1267_v55, %s2018_s22 }
 0x636   : > { %1302 = vrot.lane.b32.xlu0 %v1268_v15, %s2018_s22 }
 0x638   : > { %1304 = vrot.lane.b32.xlu1 %v1269_v14, %s2018_s22 }
 0x63a   : > { %1471 = vrot.lane.b32.xlu0 %v1292_v49, %s2016_s23  ;;  %s2020_s23 = smov [#allocation5]  }
 0x63b   : > { %s1949_s25 = sshll.u32 %s2020_s23, 4  ;;  %s1950_s25 = int_to_ptr.vmem [resolvable:$false] %s1949_s25 }
 0x63c   : > { %s1951_s22 = scalar_lea.vmem %s1950_s25, 1024  ;;  %p1952_p1 = scmp.lt.s32.totalorder %s2550_s21, %s1950_s25 }
 0x63d   : > { %p1953_p2 = scmp.lt.s32.totalorder %s1951_s22, %s1945_s27 }
 0x63f   : > { %p1954_p3 = por %p1953_p2, %p1952_p1 }
 0x641   : > { %p1955_p4 = pnand %p1954_p3, %p1948_p0 }
 0x682   : > { %v1322_v50 = vpop.permute.xlu1 %1321 }
 0x683   : > { %1332 = vst.msk [vmem:[#allocation4 + $0x8] sm:$0xff] %vm1310_vm9, %v1322_v50 }
 0x684   : > { %v1320_v1 = vpop.permute.xlu0 %1319 }
 0x685   : > { %1331 = vst.msk [vmem:[#allocation4] sm:$0xff] %vm1310_vm9, %v1320_v1  ;;  %1837 = vmatprep.mubr.msk.f32.mxu1 %vm1310_vm9, %v1320_v1 }
 0x686   : > { %1838 = vmatmul.mubr.msk.f32.vlgmr.msra.gmra.mxu1 %vm1310_vm9, %v1322_v50 }
 0x68a   : > { %v1326_v28 = vpop.permute.xlu1 %1325 }
 0x68b   : > { %1334 = vst.msk [vmem:[#allocation4 + $0x18] sm:$0xff] %vm1310_vm9, %v1326_v28 }
 0x68c   : > { %v1324_v31 = vpop.permute.xlu0 %1323 }
 0x68d   : > { %1333 = vst.msk [vmem:[#allocation4 + $0x10] sm:$0xff] %vm1310_vm9, %v1324_v31  ;;  %1840 = vmatprep.mubr.msk.f32.mxu1 %vm1310_vm9, %v1324_v31 }
 0x68e   : > { %v1458_v35 = vpop.permute.xlu1 %1457  ;;  %1841 = vmatmul.mubr.msk.f32.gmra.mxu1 %vm1310_vm9, %v1326_v28 }
 0x690   : > { %v1456_v39 = vpop.permute.xlu0 %1455 }
 0x692   : > { %v1462_v2 = vpop.permute.xlu1 %1461 }
 0x694   : > { %v1460_v23 = vpop.permute.xlu0 %1459 }
 0x696   : > { %v1470_v24 = vpop.permute.xlu1 %1469 }
 0x698   : > { %v1468_v25 = vpop.permute.xlu0 %1467 }
 0x69a   : > { %v1474_v26 = vpop.permute.xlu1 %1473 }
 0x69c   : > { %v1480_v27 = vpop.permute.xlu0 %1479 }
 0x69e   : > { %v1482_v29 = vpop.permute.xlu1 %1481 }
 0x6a0   : > { %v1484_v30 = vpop.permute.xlu0 %1483 }
 0x6a2   : > { %v1486_v32 = vpop.permute.xlu1 %1485 }
 0x6a4   : > { %v1299_v33 = vpop.permute.xlu0 %1298 }
 0x6a5   : > { %1311 = vst.msk [vmem:[#allocation3] sm:$0xff] %vm1310_vm9, %v1299_v33 }
 0x6a6   : > { %v1301_v34 = vpop.permute.xlu1 %1300 }
 0x6a7   : > { %1312 = vst.msk [vmem:[#allocation3 + $0x8] sm:$0xff] %vm1310_vm9, %v1301_v34 }
 0x6a8   : > { %v1303_v36 = vpop.permute.xlu0 %1302 }
 0x6a9   : > { %1313 = vst.msk [vmem:[#allocation3 + $0x10] sm:$0xff] %vm1310_vm9, %v1303_v36 }
 0x6aa   : > { %v1305_v37 = vpop.permute.xlu1 %1304 }
 0x6ab   : > { %1314 = vst.msk [vmem:[#allocation3 + $0x18] sm:$0xff] %vm1310_vm9, %v1305_v37 }
 0x6ac   : > { %v1472_v7 = vpop.permute.xlu0 %1471 }
 0x746   : > { %v1839_v38 = vpop.f32.mrf.mxu1 }
 0x747   : > { %1937 = vtanh.f32 %v1839_v38 }
 0x748   : > { %v1411_v40 = vpop.f32.mrf.mxu1 }
 0x749   : > { %1939 = vtanh.f32 %v1411_v40 }
 0x74e   : > { %v1842_v41 = vpop.f32.mrf.mxu1 }
 0x74f   : > { %1941 = vtanh.f32 %v1842_v41 }
 0x750   : > { %v1421_v42 = vpop.f32.mrf.mxu1 }
 0x751   : > { %1943 = vtanh.f32 %v1421_v42 }
 0x754   : > { %v1938_v43 = vpop.eup %1937 }
 0x755   : > { %v1492_v44 = vsel %vm928_vm4, %v1839_v38, %v1938_v43  ;;  %1440 = vrot.lane.b32.xlu1 %v1938_v43, %s2019_s24 }
 0x756   : > { %v1940_v45 = vpop.eup %1939  ;;  %v1496_v46 = vsel %vm935_vm5, %v1492_v44, %v1458_v35 }
 0x757   : > { %v1501_v47 = vsel %vm1499_vm10, %v1496_v46, %v1470_v24  ;;  %v1491_v48 = vsel %vm928_vm4, %v1411_v40, %v1940_v45  ;;  %1438 = vrot.lane.b32.xlu0 %v1940_v45, %s2019_s24 }
 0x758   : > { %v1506_v59 = vsel %vm1504_vm11, %v1501_v47, %v1482_v29  ;;  %v1495_v60 = vsel %vm935_vm5, %v1491_v48, %v1456_v39 }
 0x759   : > { %1511 = vst.msk [vmem:[%s2131_s28 + $0x8] sm:$0xff] %vm1509_vm12, %v1506_v59  ;;  %v1500_v61 = vsel %vm1499_vm10, %v1495_v60, %v1468_v25 }
 0x75a   : > { %v1505_v57 = vsel %vm1504_vm11, %v1500_v61, %v1480_v27 }
 0x75b   : > { %1510 = vst.msk [vmem:[%s2131_s28] sm:$0xff] %vm1509_vm12, %v1505_v57 }
 0x75c   : > { %v1942_v62 = vpop.eup %1941 }
 0x75d   : > { %v1494_v63 = vsel %vm928_vm4, %v1842_v41, %v1942_v62  ;;  %1444 = vrot.lane.b32.xlu1 %v1942_v62, %s2019_s24 }
 0x75e   : > { %v1944_v0 = vpop.eup %1943  ;;  %v1498_v58 = vsel %vm935_vm5, %v1494_v63, %v1462_v2 }
 0x75f   : > { %v1503_v9 = vsel %vm1499_vm10, %v1498_v58, %v1474_v26  ;;  %v1493_v10 = vsel %vm928_vm4, %v1421_v42, %v1944_v0  ;;  %1442 = vrot.lane.b32.xlu0 %v1944_v0, %s2019_s24 }
 0x760   : > { %v1508_v55 = vsel %vm1504_vm11, %v1503_v9, %v1486_v32  ;;  %v1497_v11 = vsel %vm935_vm5, %v1493_v10, %v1460_v23 }
 0x761   : > { %1513 = vst.msk [vmem:[%s2131_s28 + $0x18] sm:$0xff] %vm1509_vm12, %v1508_v55  ;;  %v1502_v12 = vsel %vm1499_vm10, %v1497_v11, %v1472_v7 }
 0x762   : > { %v1507_v8 = vsel %vm1504_vm11, %v1502_v12, %v1484_v30 }
 0x763   : > { %1512 = vst.msk [vmem:[%s2131_s28 + $0x10] sm:$0xff] %vm1509_vm12, %v1507_v8 }
 0x764   : > { %1958 = shalt.err (!%p1955_p4)
}
 0x765   : > { %s1959_s28 = scalar_lea.hbm %s2548_s13, 512  ;;  %s1963_s29 = scalar_lea.hbm %s2609_s9, 4096 }
 0x766   : > { %p1960_p7 = scmp.ne.s32.totalorder %s2548_s13, %s1959_s28  ;;  %p1964_p10 = scmp.lt.s32.totalorder %s2548_s13, %s2609_s9 }
 0x767   : > { %p1965_p11 = scmp.lt.s32.totalorder %s1963_s29, %s1959_s28 }
 0x768   : > { %p1961_p8 = pnand %p1960_p7, %p2111_p5 }
 0x769   : > { %p1966_p12 = por %p1965_p11, %p1964_p10 }
 0x76a   : > { %p1962_p9 = pneg %p1961_p8 }
 0x76c   : > { %p1967_p13 = pnand %p1966_p12, %p1962_p9 }
 0x76e   : > { %1970 = shalt.err (!%p1967_p13)
}
 0x76f   : > { %s2021_s27 = smov 128   ;;  %s2022_s23 = smov 8   ;;  %vm1450_vm13 = vcmask 64512  }
 0x770   : > { %1843 = dma.vmem_to_hbm [thread:$0]  (%p2111_p5), %s2550_s21, 512, %s2548_s13, %s2560_s17, %s2021_s27, %s2021_s27, %s2022_s23  }
 0x7c7   : > { %v1441_v56 = vpop.permute.xlu1 %1440 }
 0x7c8   : > { %1452 = vst.msk [vmem:[#allocation2 + $0x8] sm:$0xff] %vm1450_vm13, %v1441_v56 }
 0x7c9   : > { %v1439_v13 = vpop.permute.xlu0 %1438 }
 0x7ca   : > { %1451 = vst.msk [vmem:[#allocation2] sm:$0xff] %vm1450_vm13, %v1439_v13 }
 0x7cf   : > { %v1445_v14 = vpop.permute.xlu1 %1444 }
 0x7d0   : > { %1454 = vst.msk [vmem:[#allocation2 + $0x18] sm:$0xff] %vm1450_vm13, %v1445_v14 }
 0x7d1   : > { %v1443_v5 = vpop.permute.xlu0 %1442 }
 0x7d2   : > { %1453 = vst.msk [vmem:[#allocation2 + $0x10] sm:$0xff] %vm1450_vm13, %v1443_v5 }
 0x7d3 PF: > { %p1849_p0 = scmp.ge.s32.totalorder %s2005_s12, 2  ;;  %s1543_s25 = sand.u32 1, %s1993_s30  }
 0x7d4   : > { %s1544_s19 = scalar_lea.sflag [#allocation6], %s1543_s25 }
 0x7d5   : > { %p1846_p1 = pnand %p1849_p0, %p2115_p6 }
 0x7d7   : > { %p1847_p2 = pneg %p1846_p1 }
 0x7d9   : > { %1988 = dma.done.wait (%p1847_p2), %s1544_s19, 512  }
 0x7da   : > { %1990 = vsyncadd (%p1847_p2), %s1544_s19, 4294966784  ;;  %p19_p5 = scmp.ge.s32.totalorder %s2098_s15, 10   ;;  %s2614_s30 = smov %s1997_s10 }
 0x7db   : > { %s2615_s10 = smov %s2001_s11  ;;  %s2616_s11 = smov %s2109_s18 }
 0x7dc   : > { %s2617_s12 = smov %s2098_s15  ;;  %21 = sbr.rel (!%p19_p5) target bundleno = 3 (0x3), region = 95 }
 0x7e1   :  { %1549 = vsyncpa [#allocation6], 1 }
 0x7e2   :  { %1551 = vsyncpa [#allocation6 + $0x1], 1 }

</bundles_post_ra>
